<compile_context>
chip_gen: v6e
topology: v6e:2x2x1
jax: 0.10.0
libtpu: 0.0.40
codegen_flags: <defaults>
</compile_context>

<pallas_src>
import inspect

import jax
import jax.numpy as jnp
from jax.experimental import pallas as pl
from jax.experimental.pallas import tpu as pltpu

SCALE = 20.0        # self.scale
SIM_THRESH = 0.3    # self.sim_thresh
EPS = 1e-12         # torch.nn.functional.normalize default eps


def _round_up(x, m):
    return ((x + m - 1) // m) * m


_HAS_PIPELINE_MODE = (
    hasattr(pl, "Buffered")
    and "pipeline_mode" in inspect.signature(pl.BlockSpec).parameters
)


def _spec(block_shape, index_map, *, buffers=None):
    """BlockSpec with optional reduced multi-buffering (graceful fallback)."""
    if buffers is not None and _HAS_PIPELINE_MODE:
        return pl.BlockSpec(block_shape, index_map,
                            pipeline_mode=pl.Buffered(buffers))
    return pl.BlockSpec(block_shape, index_map)


def _vmem_limit(bytes_needed):
    """Size the scoped-VMEM limit from tile sizes; leave Mosaic headroom."""
    try:
        phys = int(pltpu.get_tpu_info().vmem_capacity_bytes)
    except Exception:  # info query unavailable -> assume v5e/v6e 128 MiB
        phys = 128 * 1024 * 1024
    return int(max(32 << 20, min(bytes_needed + (8 << 20), phys - (8 << 20))))


# --------------------------------------------------------------------------
# Kernel 1: adapter projection (K-tiled) + query normalize + diagonal logits.
# Grid = (query tiles [parallel], K tiles [arbitrary]).
# --------------------------------------------------------------------------
def _proj_kernel(q_ref, w_ref, b_ref, cpos_ref, qn_ref, diag_ref, acc_ref):
    k = pl.program_id(1)

    @pl.when(k == 0)
    def _():
        acc_ref[...] = jnp.zeros_like(acc_ref)

    # MXU matmul, f32 accumulation; weight streamed in bounded K slices.
    acc_ref[...] += jnp.dot(q_ref[...], w_ref[...],
                            preferred_element_type=jnp.float32)

    @pl.when(k == pl.num_programs(1) - 1)
    def _():
        qp = acc_ref[...] + b_ref[...].astype(jnp.float32)
        # rsqrt-fused normalize == x / max(||x||, eps)
        inv_q = jax.lax.rsqrt(
            jnp.maximum(jnp.sum(qp * qp, axis=-1, keepdims=True), EPS * EPS))
        qn = qp * inv_q
        qn_ref[...] = qn
        # Diagonal (positive) logits: row-wise dot with the aligned,
        # already-normalized context rows (labels = arange(B)).
        d = jnp.sum(qn * cpos_ref[...].astype(jnp.float32),
                    axis=-1, keepdims=True)
        diag_ref[...] = jnp.where(d >= SIM_THRESH, d * SCALE, 0.0)


# --------------------------------------------------------------------------
# Kernel 2: score matmul + threshold/scale + fixed-max logsumexp.
# Grid = (query tiles [parallel], context tiles [arbitrary, last]).
# --------------------------------------------------------------------------
def _make_score_kernel(n_actual, n_padded, tn, mm_dtype):
    mask_cols = n_padded != n_actual

    def kernel(qn_ref, diag_ref, c_ref, out_ref, l_scr):
        j = pl.program_id(1)

        @pl.when(j == 0)
        def _():
            l_scr[...] = jnp.zeros_like(l_scr)

        # (TB, D) x (TN, D)^T contracted on D (MXU, f32 accumulation).
        s = jax.lax.dot_general(
            qn_ref[...].astype(mm_dtype), c_ref[...].astype(mm_dtype),
            (((1,), (1,)), ((), ())), preferred_element_type=jnp.float32)

        # Threshold + scale in one select (matches: s * (s >= t) * scale).
        s = jnp.where(s >= SIM_THRESH, s * SCALE, 0.0)

        # Fixed-max logsumexp: thresholded+scaled scores live in [0, SCALE],
        # so exp(s - SCALE) never overflows and no online max is needed.
        p = jnp.exp(s - SCALE)
        if mask_cols:
            # Padding only lives at the tail; a (1, TN) lane iota broadcast in
            # the compare is enough (no full (TB, TN) iota).
            lane = jax.lax.broadcasted_iota(jnp.int32, (1, tn), 1)
            p = jnp.where(lane < (n_actual - j * tn), p, 0.0)
        l_scr[...] += jnp.sum(p, axis=-1, keepdims=True)

        @pl.when(j == pl.num_programs(1) - 1)
        def _():
            # per-row cross-entropy term: logsumexp - positive logit
            out_ref[...] = (SCALE + jnp.log(l_scr[...])) - diag_ref[...]

    return kernel


def mnr_loss(query_embeds, context_embeds, adapter_w, adapter_b, *,
             tb=512, tn=1024, tk=512, matmul_dtype=None):
    """Scalar MultipleNegativesRankingLoss (float32)."""
    B, Din = query_embeds.shape
    N, Dc = context_embeds.shape
    Win, Dout = adapter_w.shape
    assert Din == Win and Dout == Dc, "adapter must map query dim to context dim"
    assert N >= B, "labels = arange(B) requires N >= B"

    if matmul_dtype is None:
        # bf16 score-matmul only when every operand is already bf16; otherwise
        # keep f32 so values near SIM_THRESH don't flip across the threshold.
        all_bf16 = all(a.dtype == jnp.bfloat16
                       for a in (query_embeds, context_embeds, adapter_w))
        matmul_dtype = jnp.bfloat16 if all_bf16 else jnp.float32
    mm_dtype = jnp.dtype(matmul_dtype)

    # ---- tile sizes / padding (lane-dense D, sublane-aligned B / N) --------
    Dop = _round_up(Dout, 128)                       # projected / context dim
    TK = _round_up(min(tk, Din), 128)                # adapter-weight K slice
    Dip = _round_up(Din, TK)

    TB = _round_up(min(tb, B), 8)
    if B <= TB and B > 8:
        # v7x megacore: keep >= 2 steps on the parallel (query) axis.
        TB = _round_up(-(-B // 2), 8)
    Bp = _round_up(B, TB)

    TN = _round_up(min(tn, N), 8)
    Np = _round_up(N, TN)

    f32 = jnp.float32

    # ---- wrapper-side prep: pad + pre-normalize contexts ONCE --------------
    c32 = context_embeds.astype(f32)
    inv_c = jax.lax.rsqrt(
        jnp.maximum(jnp.sum(c32 * c32, axis=-1, keepdims=True), EPS * EPS))
    cn = c32 * inv_c
    cn_p = jnp.pad(cn.astype(mm_dtype), ((0, Np - N), (0, Dop - Dout)))
    # Positives aligned with the queries (labels = arange(B)), kept f32.
    cpos_p = jnp.pad(cn[:B], ((0, Bp - B), (0, Dop - Dout)))

    q_p = jnp.pad(query_embeds, ((0, Bp - B), (0, Dip - Din)))
    w_p = jnp.pad(adapter_w, ((0, Dip - Din), (0, Dop - Dout)))
    b_p = jnp.pad(adapter_b.reshape(1, -1), ((0, 0), (0, Dop - Dout)))

    # ---- kernel 1: projection + query normalize + diagonal logits ----------
    q_item = jnp.dtype(query_embeds.dtype).itemsize
    w_item = jnp.dtype(adapter_w.dtype).itemsize
    proj_bytes = (2 * TB * TK * q_item          # query K-slices
                  + 2 * TK * Dop * w_item       # weight K-slices
                  + 2 * 8 * Dop * 4             # bias (sublane padded)
                  + 2 * TB * Dop * 4            # aligned positives
                  + 2 * TB * Dop * 4            # qn output
                  + 2 * TB * 128 * 4            # diag output (lane padded)
                  + TB * Dop * 4)               # f32 accumulator scratch

    qn, diag = pl.pallas_call(
        _proj_kernel,
        out_shape=(jax.ShapeDtypeStruct((Bp, Dop), f32),
                   jax.ShapeDtypeStruct((Bp, 1), f32)),
        grid_spec=pltpu.PrefetchScalarGridSpec(
            num_scalar_prefetch=0,
            grid=(Bp // TB, Dip // TK),
            in_specs=[
                pl.BlockSpec((TB, TK), lambda i, k: (i, k)),       # queries
                pl.BlockSpec((TK, Dop), lambda i, k: (k, 0)),      # adapter W
                _spec((1, Dop), lambda i, k: (0, 0), buffers=1),   # adapter b
                _spec((TB, Dop), lambda i, k: (i, 0), buffers=1),  # positives
            ],
            out_specs=[
                pl.BlockSpec((TB, Dop), lambda i, k: (i, 0)),      # qn
                pl.BlockSpec((TB, 1), lambda i, k: (i, 0)),        # diag logits
            ],
            scratch_shapes=[pltpu.VMEM((TB, Dop), jnp.float32)],
        ),
        compiler_params=pltpu.CompilerParams(
            dimension_semantics=("parallel", "arbitrary"),
            vmem_limit_bytes=_vmem_limit(proj_bytes),
        ),
    )(q_p, w_p, b_p, cpos_p)

    # ---- kernel 2: flash-style scores + fixed-max logsumexp ----------------
    c_item = jnp.dtype(mm_dtype).itemsize
    qn_bufs = 1 if _HAS_PIPELINE_MODE else 2
    score_bytes = (qn_bufs * TB * Dop * 4       # normalized queries
                   + qn_bufs * TB * 128 * 4     # diag (lane padded)
                   + 2 * TN * Dop * c_item      # context tiles (double buffer)
                   + 2 * TB * 128 * 4           # output
                   + TB * 128 * 4)              # l scratch

    score_kernel = _make_score_kernel(N, Np, TN, mm_dtype)
    per_row = pl.pallas_call(
        score_kernel,
        out_shape=jax.ShapeDtypeStruct((Bp, 1), jnp.float32),
        grid_spec=pltpu.PrefetchScalarGridSpec(
            num_scalar_prefetch=0,
            grid=(Bp // TB, Np // TN),
            in_specs=[
                _spec((TB, Dop), lambda i, j: (i, 0), buffers=1),  # qn
                _spec((TB, 1), lambda i, j: (i, 0), buffers=1),    # diag logits
                pl.BlockSpec((TN, Dop), lambda i, j: (j, 0)),      # contexts
            ],
            out_specs=pl.BlockSpec((TB, 1), lambda i, j: (i, 0)),
            scratch_shapes=[pltpu.VMEM((TB, 1), jnp.float32)],     # running sum
        ),
        compiler_params=pltpu.CompilerParams(
            dimension_semantics=("parallel", "arbitrary"),
            vmem_limit_bytes=_vmem_limit(score_bytes),
        ),
    )(qn, diag, cn_p)

    # Drop padded query rows; mean reduction of CrossEntropyLoss.
    return jnp.mean(per_row[:B, 0])


def mnr_loss_ref(query_embeds, context_embeds, adapter_w, adapter_b):
    """Pure-JAX reference mirroring the PyTorch forward."""
    qp = (query_embeds.astype(jnp.float32) @ adapter_w.astype(jnp.float32)
          + adapter_b.astype(jnp.float32))
    qn = qp / jnp.maximum(jnp.linalg.norm(qp, axis=-1, keepdims=True), EPS)
    c = context_embeds.astype(jnp.float32)
    cn = c / jnp.maximum(jnp.linalg.norm(c, axis=-1, keepdims=True), EPS)
    scores = qn @ cn.T
    scores = jnp.where(scores >= SIM_THRESH, scores * SCALE, 0.0)
    lse = jax.nn.logsumexp(scores, axis=-1)
    idx = jnp.arange(scores.shape[0])
    return jnp.mean(lse - scores[idx, idx])


def _run_case(key, B, N, D, tb, tn, tk):
    k1, k2, k3, k4 = jax.random.split(key, 4)
    q = jax.random.normal(k1, (B, D), dtype=jnp.float32)
    c = jax.random.normal(k2, (N, D), dtype=jnp.float32)
    w = jax.random.normal(k3, (D, D), dtype=jnp.float32) / jnp.sqrt(D)
    b = 0.01 * jax.random.normal(k4, (D,), dtype=jnp.float32)

    loss = mnr_loss(q, c, w, b, tb=tb, tn=tn, tk=tk)
    jax.block_until_ready(loss)
    ref = mnr_loss_ref(q, c, w, b)
    assert jnp.allclose(loss, ref, atol=5e-4, rtol=5e-4), (loss, ref)
    return loss


if __name__ == "__main__":
    key = jax.random.PRNGKey(0)
    k1, k2 = jax.random.split(key)

    # Case 1: the module's nominal small shape (single-tile grid).
    _run_case(k1, B=8, N=8, D=32, tb=512, tn=1024, tk=512)

    # Case 2: multi-tile i/j grid, row padding, tail-column masking, and
    # K-tiled adapter projection (D=200 -> two 128-wide K slices).
    _run_case(k2, B=20, N=28, D=200, tb=8, tn=16, tk=128)

    print("KERNEL_OK")
</pallas_src>

<mosaic_0001>
module attributes {stable_mosaic.version = 11 : i64} {
  func.func @_proj_kernel(%arg0: i32, %arg1: i32, %arg2: memref<8x128xf32, #tpu.memory_space<vmem>>, %arg3: memref<128x128xf32, #tpu.memory_space<vmem>>, %arg4: memref<1x128xf32, #tpu.memory_space<vmem>>, %arg5: memref<8x128xf32, #tpu.memory_space<vmem>>, %arg6: memref<8x128xf32, #tpu.memory_space<vmem>>, %arg7: memref<8x1xf32, #tpu.memory_space<vmem>>, %arg8: memref<8x128xf32, #tpu.memory_space<vmem>>) attributes {dimension_semantics = [#tpu.dimension_semantics<parallel>, #tpu.dimension_semantics<arbitrary>], iteration_bounds = array<i64: 1, 1>, scalar_prefetch = 0 : i64, scratch_operands = 1 : i64, tpu.core_type = #tpu.core_type<tc>, window_params = [{transform_indices = @transform_0, window_bounds = array<i64: 8, 128>}, {transform_indices = @transform_1, window_bounds = array<i64: 128, 128>}, {pipeline_mode = #tpu.pipeline_mode<synchronous>, transform_indices = @transform_2, window_bounds = array<i64: 1, 128>}, {pipeline_mode = #tpu.pipeline_mode<synchronous>, transform_indices = @transform_3, window_bounds = array<i64: 8, 128>}, {transform_indices = @transform_4, window_bounds = array<i64: 8, 128>}, {transform_indices = @transform_5, window_bounds = array<i64: 8, 1>}]} {
    %c0_i32 = arith.constant 0 : i32
    %0 = arith.cmpi eq, %arg1, %c0_i32 : i32
    %1 = arith.extui %0 : i1 to i32
    %c0_i32_0 = arith.constant 0 : i32
    %2 = arith.cmpi ne, %1, %c0_i32_0 : i32
    scf.if %2 {
      %cst_10 = arith.constant 0.000000e+00 : f32
      %12 = vector.broadcast %cst_10 : f32 to vector<8x128xf32>
      %c0_11 = arith.constant 0 : index
      %c0_12 = arith.constant 0 : index
      %13 = vector.load %arg8[%c0_11, %c0_12] : memref<8x128xf32, #tpu.memory_space<vmem>>, vector<8x128xf32>
      tpu.vector_store %arg8[%c0_11, %c0_12], %12 {strides = array<i32>} : memref<8x128xf32, #tpu.memory_space<vmem>>, vector<8x128xf32>,
    } else {
    }
    %c0 = arith.constant 0 : index
    %c0_1 = arith.constant 0 : index
    %3 = vector.load %arg8[%c0, %c0_1] : memref<8x128xf32, #tpu.memory_space<vmem>>, vector<8x128xf32>
    %c0_2 = arith.constant 0 : index
    %c0_3 = arith.constant 0 : index
    %4 = vector.load %arg2[%c0_2, %c0_3] : memref<8x128xf32, #tpu.memory_space<vmem>>, vector<8x128xf32>
    %c0_4 = arith.constant 0 : index
    %c0_5 = arith.constant 0 : index
    %5 = vector.load %arg3[%c0_4, %c0_5] : memref<128x128xf32, #tpu.memory_space<vmem>>, vector<128x128xf32>
    %cst = arith.constant dense<0.000000e+00> : vector<8x128xf32>
    %6 = tpu.matmul %4, %5, %cst {dimension_numbers = #tpu.dot_dimension_numbers<[1], [0], [0], [1], [0, 0, 1, 1], [], []>} : vector<8x128xf32>, vector<128x128xf32>, vector<8x128xf32> -> vector<8x128xf32>
    %7 = arith.addf %3, %6 : vector<8x128xf32>
    %c0_6 = arith.constant 0 : index
    %c0_7 = arith.constant 0 : index
    %8 = vector.load %arg8[%c0_6, %c0_7] : memref<8x128xf32, #tpu.memory_space<vmem>>, vector<8x128xf32>
    tpu.vector_store %arg8[%c0_6, %c0_7], %7 {strides = array<i32>} : memref<8x128xf32, #tpu.memory_space<vmem>>, vector<8x128xf32>,
    %c0_i32_8 = arith.constant 0 : i32
    %9 = arith.cmpi eq, %arg1, %c0_i32_8 : i32
    %10 = arith.extui %9 : i1 to i32
    %c0_i32_9 = arith.constant 0 : i32
    %11 = arith.cmpi ne, %10, %c0_i32_9 : i32
    scf.if %11 {
      %c0_10 = arith.constant 0 : index
      %c0_11 = arith.constant 0 : index
      %12 = vector.load %arg8[%c0_10, %c0_11] : memref<8x128xf32, #tpu.memory_space<vmem>>, vector<8x128xf32>
      %c0_12 = arith.constant 0 : index
      %c0_13 = arith.constant 0 : index
      %13 = vector.load %arg4[%c0_12, %c0_13] : memref<1x128xf32, #tpu.memory_space<vmem>>, vector<1x128xf32>
      %14 = vector.broadcast %13 : vector<1x128xf32> to vector<8x128xf32>
      %15 = arith.addf %12, %14 : vector<8x128xf32>
      %16 = arith.mulf %15, %15 : vector<8x128xf32>
      %cst_14 = arith.constant dense<0.000000e+00> : vector<8xf32>
      %17 = vector.multi_reduction <add>, %16, %cst_14 [1] : vector<8x128xf32> to vector<8xf32>
      %18 = vector.shape_cast %17 : vector<8xf32> to vector<8x1xf32>
      %cst_15 = arith.constant 1.000000e-24 : f32
      %19 = vector.broadcast %cst_15 : f32 to vector<8x1xf32>
      %20 = arith.maximumf %18, %19 : vector<8x1xf32>
      %21 = math.rsqrt %20 : vector<8x1xf32>
      %22 = vector.broadcast %21 : vector<8x1xf32> to vector<8x128xf32>
      %23 = arith.mulf %15, %22 : vector<8x128xf32>
      %c0_16 = arith.constant 0 : index
      %c0_17 = arith.constant 0 : index
      %24 = vector.load %arg6[%c0_16, %c0_17] : memref<8x128xf32, #tpu.memory_space<vmem>>, vector<8x128xf32>
      tpu.vector_store %arg6[%c0_16, %c0_17], %23 {strides = array<i32>} : memref<8x128xf32, #tpu.memory_space<vmem>>, vector<8x128xf32>,
      %c0_18 = arith.constant 0 : index
      %c0_19 = arith.constant 0 : index
      %25 = vector.load %arg5[%c0_18, %c0_19] : memref<8x128xf32, #tpu.memory_space<vmem>>, vector<8x128xf32>
      %26 = arith.mulf %23, %25 : vector<8x128xf32>
      %cst_20 = arith.constant dense<0.000000e+00> : vector<8xf32>
      %27 = vector.multi_reduction <add>, %26, %cst_20 [1] : vector<8x128xf32> to vector<8xf32>
      %28 = vector.shape_cast %27 : vector<8xf32> to vector<8x1xf32>
      %cst_21 = arith.constant 3.000000e-01 : f32
      %29 = vector.broadcast %cst_21 : f32 to vector<8x1xf32>
      %30 = arith.cmpf oge, %28, %29 : vector<8x1xf32>
      %cst_22 = arith.constant 2.000000e+01 : f32
      %31 = vector.broadcast %cst_22 : f32 to vector<8x1xf32>
      %32 = arith.mulf %28, %31 : vector<8x1xf32>
      %cst_23 = arith.constant 0.000000e+00 : f32
      %33 = vector.broadcast %cst_23 : f32 to vector<8x1xf32>
      %34 = arith.select %30, %32, %33 : vector<8x1xi1>, vector<8x1xf32>
      %c0_24 = arith.constant 0 : index
      %c0_25 = arith.constant 0 : index
      %35 = vector.load %arg7[%c0_24, %c0_25] : memref<8x1xf32, #tpu.memory_space<vmem>>, vector<8x1xf32>
      tpu.vector_store %arg7[%c0_24, %c0_25], %34 {strides = array<i32>} : memref<8x1xf32, #tpu.memory_space<vmem>>, vector<8x1xf32>,
    } else {
    }
    return
  }
  func.func @transform_0(%arg0: i32, %arg1: i32) -> (i32, i32) {
    %c0_i32 = arith.constant 0 : i32
    return %arg0, %arg1 : i32, i32
  }
  func.func @transform_1(%arg0: i32, %arg1: i32) -> (i32, i32) {
    %c0_i32 = arith.constant 0 : i32
    %c0_i32_0 = arith.constant 0 : i32
    return %arg1, %c0_i32 : i32, i32
  }
  func.func @transform_2(%arg0: i32, %arg1: i32) -> (i32, i32) {
    %c0_i32 = arith.constant 0 : i32
    %c0_i32_0 = arith.constant 0 : i32
    %c0_i32_1 = arith.constant 0 : i32
    return %c0_i32, %c0_i32_0 : i32, i32
  }
  func.func @transform_3(%arg0: i32, %arg1: i32) -> (i32, i32) {
    %c0_i32 = arith.constant 0 : i32
    %c0_i32_0 = arith.constant 0 : i32
    return %arg0, %c0_i32 : i32, i32
  }
  func.func @transform_4(%arg0: i32, %arg1: i32) -> (i32, i32) {
    %c0_i32 = arith.constant 0 : i32
    %c0_i32_0 = arith.constant 0 : i32
    return %arg0, %c0_i32 : i32, i32
  }
  func.func @transform_5(%arg0: i32, %arg1: i32) -> (i32, i32) {
    %c0_i32 = arith.constant 0 : i32
    %c0_i32_0 = arith.constant 0 : i32
    return %arg0, %c0_i32 : i32, i32
  }
}

</mosaic_0001>

<bundles_post_ra>
// kernel: tpu_custom_call.1
= control target key start
LH: loop header
LB: loop body
LE: loop exit
PB: predicated region body
PF: predicated region fallthrough
CT: control target
= control target key end

     0   :  { %11 = vsyncpa [#allocation4], 0  ;;  %s405_s0 = inlined_call_operand.hbm [shape: f32[8,128], index: 0, kind: input, shape index: {}]   ;;  %s406_s1 = inlined_call_operand.hbm [shape: f32[128,128], index: 1, kind: input, shape index: {}]   ;;  %s407_s2 = inlined_call_operand.vmem [shape: f32[1,128], index: 2, kind: input, shape index: {}]   ;;  %s408_s3 = inlined_call_operand.hbm [shape: f32[8,128], index: 3, kind: input, shape index: {}]   ;;  %s409_s4 = inlined_call_operand.hbm [shape: f32[8,128], index: 4, kind: output, shape index: {0}]   ;;  %s410_s5 = inlined_call_operand.vmem [shape: f32[8,1], index: 5, kind: output, shape index: {1}]  }
   0x1   :  { %12 = vsyncpa [#allocation7], 0 }
   0x2   :  { %13 = vsyncpa [#allocation5], 0  ;;  %s349_s18 = smov [#allocation6]  }
   0x3   :  { %s29_s19 = sshll.u32 %s349_s18, 4  ;;  %s30_s19 = int_to_ptr.vmem [resolvable:$true] %s29_s19 }
   0x4   :  { %s271_s20 = scalar_lea.vmem %s30_s19, 2048  ;;  %p276_p1 = scmp.lt.s32.totalorder %s30_s19, %s30_s19 }
   0x5   :  { %p272_p0 = scmp.ne.s32.totalorder %s30_s19, %s271_s20  ;;  %p277_p2 = scmp.lt.s32.totalorder %s271_s20, %s271_s20 }
   0x7   :  { %p278_p3 = por %p277_p2, %p276_p1 }
   0x9   :  { %p279_p4 = pnand %p278_p3, %p272_p0 }
   0xb   :  { %282 = shalt.err (!%p279_p4)
}
   0xc   :  { %s350_s21 = smov 128   ;;  %s351_s22 = smov 8  }
   0xd   :  { %35 = dma.hbm_to_vmem [thread:$0]  %s406_s1, 2048, %s30_s19, [#allocation7], %s350_s21, %s350_s21, %s351_s22  }
   0xe   :  { %s352_s25 = smov [#allocation3]   ;;  %s353_s27 = smov [#allocation8]  }
   0xf   :  { %s20_s26 = sshll.u32 %s352_s25, 4  ;;  %s44_s28 = sshll.u32 %s353_s27, 4  ;;  %s21_s26 = int_to_ptr.vmem [resolvable:$true] %s20_s26  ;;  %s45_s28 = int_to_ptr.vmem [resolvable:$true] %s44_s28 }
  0x10   :  { %s291_s29 = scalar_lea.vmem %s21_s26, 128  ;;  %p296_p6 = scmp.lt.s32.totalorder %s21_s26, %s21_s26 }
  0x11   :  { %p292_p5 = scmp.ne.s32.totalorder %s21_s26, %s291_s29  ;;  %p297_p7 = scmp.lt.s32.totalorder %s291_s29, %s291_s29 }
  0x13   :  { %p298_p8 = por %p297_p7, %p296_p6 }
  0x15   :  { %p299_p9 = pnand %p298_p8, %p292_p5 }
  0x17   :  { %302 = shalt.err (!%p299_p9)
}
  0x18   :  { %23 = dma.hbm_to_vmem [thread:$0]  %s405_s0, 128, %s21_s26, [#allocation4]  }
  0x19   :  { %s311_s7 = scalar_lea.vmem %s45_s28, 128  ;;  %p316_p11 = scmp.lt.s32.totalorder %s45_s28, %s45_s28 }
  0x1a   :  { %p312_p10 = scmp.ne.s32.totalorder %s45_s28, %s311_s7  ;;  %p317_p12 = scmp.lt.s32.totalorder %s311_s7, %s311_s7 }
  0x1c   :  { %p318_p13 = por %p317_p12, %p316_p11 }
  0x1e   :  { %p319_p0 = pnand %p318_p13, %p312_p10 }
  0x20   :  { %322 = shalt.err (!%p319_p0)
}
  0x21   :  { %47 = dma.hbm_to_vmem [thread:$0]  %s408_s3, 128, %s45_s28, [#allocation7]  }
  0x22   :  { %343 = dma.done.wait [#allocation4], 128  }
  0x23   :  { %344 = vsyncadd [#allocation4], 4294967168 }
  0x24   :  { %345 = dma.done.wait [#allocation7], 2176  }
  0x25   :  { %346 = vsyncadd [#allocation7], 4294965120  ;;  %v354_v0 = vmov 0.0   ;;  %vm355_vm0 = vmmov 0   ;;  %v79_v1 = vld [vmem:[#allocation6 + $0x78] sm:$0xff]  ;;  %v78_v2 = vld [vmem:[#allocation6 + $0x70] sm:$0xff] }
  0x26   :  { %218 = vmatprep.subr.mxu0 %v354_v0  ;;  %250 = vmatprep.mubr.msk.f32.mxu0 %vm355_vm0, %v354_v0  ;;  %v77_v3 = vld [vmem:[#allocation6 + $0x68] sm:$0xff]  ;;  %v76_v4 = vld [vmem:[#allocation6 + $0x60] sm:$0xff]  ;;  %v75_v5 = vld [vmem:[#allocation6 + $0x58] sm:$0xff]  ;;  %s356_s9 = smov [#allocation9]  }
  0x27   :  { %219 = vmatpush3.msra.mxu0 %v79_v1  ;;  %v74_v6 = vld [vmem:[#allocation6 + $0x50] sm:$0xff]  ;;  %v73_v7 = vld [vmem:[#allocation6 + $0x48] sm:$0xff]  ;;  %v72_v8 = vld [vmem:[#allocation6 + $0x40] sm:$0xff]  ;;  %s186_s10 = sshll.u32 %s356_s9, 4  ;;  %s187_s10 = int_to_ptr.vmem [resolvable:$true] %s186_s10 }
  0x28   :  { %220 = vmatprep.subr.mxu0 %v354_v0  ;;  %v71_v9 = vld [vmem:[#allocation6 + $0x38] sm:$0xff]  ;;  %v70_v10 = vld [vmem:[#allocation6 + $0x30] sm:$0xff]  ;;  %v69_v11 = vld [vmem:[#allocation6 + $0x28] sm:$0xff]  ;;  %s323_s11 = scalar_lea.vmem %s187_s10, 128  ;;  %p328_p2 = scmp.lt.s32.totalorder %s187_s10, %s187_s10 }
  0x29   :  { %221 = vmatpush3.msra.mxu0 %v78_v2  ;;  %v68_v12 = vld [vmem:[#allocation6 + $0x20] sm:$0xff]  ;;  %v67_v13 = vld [vmem:[#allocation6 + $0x18] sm:$0xff]  ;;  %v66_v14 = vld [vmem:[#allocation6 + $0x10] sm:$0xff]  ;;  %p324_p1 = scmp.ne.s32.totalorder %s187_s10, %s323_s11  ;;  %p329_p3 = scmp.lt.s32.totalorder %s323_s11, %s323_s11 }
  0x2a   :  { %222 = vmatprep.subr.mxu0 %v354_v0  ;;  %v65_v15 = vld [vmem:[#allocation6 + $0x8] sm:$0xff]  ;;  %v64_v16 = vld [vmem:[#allocation6] sm:$0xff]  ;;  %v63_v17 = vld [vmem:[#allocation3] sm:$0xff] }
  0x2b   :  { %223 = vmatpush3.msra.mxu0 %v77_v3  ;;  %v200_v18 = vld [vmem:[%s407_s2] ss:$0 sm:$0xff]  ;;  %v171_v26 = vld [vmem:[#allocation8] sm:$0xff]  ;;  %p330_p4 = por %p329_p3, %p328_p2 }
  0x2c   :  { %224 = vmatprep.subr.mxu0 %v354_v0 }
  0x2d   :  { %225 = vmatpush3.msra.mxu0 %v76_v4  ;;  %p331_p5 = pnand %p330_p4, %p324_p1 }
  0x2e   :  { %226 = vmatprep.subr.mxu0 %v354_v0 }
  0x2f   :  { %227 = vmatpush3.msra.mxu0 %v75_v5 }
  0x30   :  { %228 = vmatprep.subr.mxu0 %v354_v0 }
  0x31   :  { %229 = vmatpush3.msra.mxu0 %v74_v6 }
  0x32   :  { %230 = vmatprep.subr.mxu0 %v354_v0 }
  0x33   :  { %231 = vmatpush3.msra.mxu0 %v73_v7 }
  0x34   :  { %232 = vmatprep.subr.mxu0 %v354_v0 }
  0x35   :  { %233 = vmatpush3.msra.mxu0 %v72_v8 }
  0x36   :  { %234 = vmatprep.subr.mxu0 %v354_v0 }
  0x37   :  { %235 = vmatpush3.msra.mxu0 %v71_v9 }
  0x38   :  { %236 = vmatprep.subr.mxu0 %v354_v0 }
  0x39   :  { %237 = vmatpush3.msra.mxu0 %v70_v10 }
  0x3a   :  { %238 = vmatprep.subr.mxu0 %v354_v0 }
  0x3b   :  { %239 = vmatpush3.msra.mxu0 %v69_v11 }
  0x3c   :  { %240 = vmatprep.subr.mxu0 %v354_v0 }
  0x3d   :  { %241 = vmatpush3.msra.mxu0 %v68_v12 }
  0x3e   :  { %242 = vmatprep.subr.mxu0 %v354_v0 }
  0x3f   :  { %243 = vmatpush3.msra.mxu0 %v67_v13 }
  0x40   :  { %244 = vmatprep.subr.mxu0 %v354_v0 }
  0x41   :  { %245 = vmatpush3.msra.mxu0 %v66_v14 }
  0x42   :  { %246 = vmatprep.subr.mxu0 %v354_v0 }
  0x43   :  { %247 = vmatpush3.msra.mxu0 %v65_v15 }
  0x44   :  { %248 = vmatprep.subr.mxu0 %v354_v0 }
  0x45   :  { %249 = vmatpush3.msra.mxu0 %v64_v16 }
  0x46   :  { %251 = vmatmul.mubr.f32.vlgmr.msra.gmra.mxu0 %v63_v17 }
 0x106   :  { %v146_v19 = vpop.f32.mrf.mxu0 }
 0x107   :  { %v163_v20 = vadd.f32 %v200_v18, %v146_v19 }
 0x108   :  { %v252_v21 = vpop.f32.mrf.mxu0 }
 0x109   :  { %v164_v22 = vmul.f32 %v163_v20, %v163_v20 }
 0x10b   :  { %165 = vadd.xlane.f32.xlu0 %v164_v22 }
 0x194   :  { %v166_v23 = vpop.xlane.xlu0 %165 }
 0x195   :  { %v167_v24 = vmax.f32 %v166_v23, 1e-24 }
 0x197   :  { %261 = vrsqrt.f32 %v167_v24 }
 0x1a4   :  { %v262_v25 = vpop.eup %261 }
 0x1a5   :  { %v169_v27 = vmul.f32 %v262_v25, %v163_v20 }
 0x1a7   :  { %v172_v28 = vmul.f32 %v171_v26, %v169_v27  ;;  %170 = vst [vmem:[#allocation9] sm:$0xff] %v169_v27 }
 0x1a9   :  { %173 = vadd.xlane.f32.xlu0 %v172_v28 }
 0x1aa   :  { %334 = shalt.err (!%p331_p5)
}
 0x1ab   :  { %189 = dma.vmem_to_hbm [thread:$0]  %s187_s10, 128, %s409_s4, [#allocation5]   ;;  %vm178_vm1 = vcmask 7168  }
 0x232   :  { %v174_v29 = vpop.xlane.xlu0 %173 }
 0x233   :  { %vm175_vm2 = vcmp.ge.f32.partialorder %v174_v29, 0.3  ;;  %v176_v30 = vmul.f32 20.0, %v174_v29 }
 0x235   :  { %v177_v31 = vsel %vm175_vm2, %v176_v30, 0.0 }
 0x236   :  { %179 = vst.msk [vmem:[%s410_s5] sm:$0xff] %vm178_vm1, %v177_v31 }
 0x237   :  { %347 = dma.done.wait [#allocation5], 128  }
 0x238   :  { %348 = vsyncadd [#allocation5], 4294967168 }
 0x239   :  { %197 = vsyncpa [#allocation4], 1 }
 0x23a   :  { %198 = vsyncpa [#allocation7], 1 }
 0x23b   :  { %199 = vsyncpa [#allocation5], 1 }

</bundles_post_ra>
